<compile_context>
chip_gen: v7x
topology: tpu7x:2x2x1
jax: 0.10.0
libtpu: 0.0.40
codegen_flags: <defaults>
</compile_context>

<pallas_src>
import functools

import jax
import jax.numpy as jnp
from jax import lax
from jax.experimental import pallas as pl
from jax.experimental.pallas import tpu as pltpu
import numpy as np

N_GRAMS = (1, 2, 3, 4)
LANE = 128
_NEG_BIG = -1e30  # effectively -inf for the padded class columns


def _round_up(x, m):
    return (x + m - 1) // m * m


# ----------------------------- Pallas kernel --------------------------------


def cnn_cbow_kernel(tok_ref, len_ref, table_ref, bias_ref, wp_ref, wl_ref,
                    blin_ref, out_ref):
    """One grid step handles a batch tile TB; everything lives in VMEM.

    tok_ref  : (TB*S, 1)        int32  token ids (batch-major rows: b*S + s)
    len_ref  : (TB, 1)          f32    sequence lengths
    table_ref: (V, 10*Cp + Op)  bf16   emb @ [conv taps | wa], lane-padded
    bias_ref : (1, 4*Cp)        f32    conv biases, one 128-band per n-gram
    wp_ref   : (Cp, Op)         f32    linear slice acting on pooled features
    wl_ref   : (1, Op)          f32    linear slice acting on the length feature
    blin_ref : (1, Op)          f32    linear bias; padded class cols = -1e30
    out_ref  : (TB, Op)         f32    log-probabilities (padded classes junk)
    """
    V = table_ref.shape[0]
    TB, _ = out_ref.shape
    BS = tok_ref.shape[0]
    S = BS // TB
    cp = bias_ref.shape[1] // len(N_GRAMS)          # 128
    n_taps = sum(N_GRAMS)                           # 10

    # --- fused gather + conv taps + CBoW-linear: ONE MXU matmul --------------
    vocab_iota = lax.broadcasted_iota(jnp.int32, (BS, V), 1)
    onehot = (tok_ref[...] == vocab_iota).astype(jnp.bfloat16)     # (BS, V)
    big = jnp.dot(onehot, table_ref[...],
                  preferred_element_type=jnp.float32)              # (BS, 10Cp+Op)
    # Lane dim (multiple of 128) is preserved: pure sublane regrouping.
    big3 = big.reshape(TB, S, n_taps * cp + wp_ref.shape[1])       # (TB,S,10Cp+Op)

    # --- per-n-gram shift-add + bias + ReLU + max-pool (lane-aligned slices) --
    branch_maxes = []
    base = 0
    for n in N_GRAMS:
        if S >= n:                  # matches `if embedded.size(2) >= kernel`
            lout = S - n + 1
            acc = big3[:, 0:lout, base:base + cp]
            for k in range(1, n):
                acc = acc + big3[:, k:k + lout,
                                 base + k * cp:base + (k + 1) * cp]
            bias_n = bias_ref[:, (n - 1) * cp:n * cp]              # (1, Cp)
            acc = jnp.maximum(acc + bias_n, 0.0)                   # ReLU
            branch_maxes.append(jnp.max(acc, axis=1))              # (TB, Cp)
        base += n * cp
    # S >= 1 always, so conv1 contributes and no -inf init is needed.
    pooled = functools.reduce(jnp.maximum, branch_maxes)           # (TB, Cp)
    # Padded lanes of `pooled` are exactly 0 (zero taps + zero bias + ReLU) and
    # meet zero rows of wp, so they contribute nothing.

    # --- CBoW average: wa was folded into the table, so just average ---------
    avg_logits = jnp.mean(big3[:, :, n_taps * cp:], axis=1)        # (TB, Op)

    # --- linear + log_softmax (padded class cols pinned to -1e30) ------------
    logits = (jnp.dot(pooled, wp_ref[...], preferred_element_type=jnp.float32)
              + avg_logits
              + len_ref[...] * wl_ref[...]
              + blin_ref[...])                                     # (TB, Op)
    m = jnp.max(logits, axis=1, keepdims=True)
    z = logits - m
    lse = jnp.log(jnp.sum(jnp.exp(z), axis=1, keepdims=True))
    out_ref[...] = z - lse                                         # lane-dense store


# ------------------------------ wrappers -------------------------------------


def prepare_params(params):
    """One-time parameter repacking / fusing (keep out of the per-call path)."""
    emb = params["emb"].astype(jnp.float32)                 # (V, C)
    V, C = emb.shape
    O = int(params["lin_b"].shape[0])
    Cp = _round_up(C, LANE)
    Op = _round_up(O, LANE)

    lw = params["lin_w"].astype(jnp.float32)                # (O, 2C+1)
    wp = lw[:, :C].T                                        # (C, O) pooled slice
    wa = lw[:, C:2 * C].T                                   # (C, O) CBoW-avg slice
    wl = lw[:, 2 * C:2 * C + 1].T                           # (1, O) length slice

    def pad_cols(a, width):
        return jnp.pad(a, ((0, 0), (0, width - a.shape[1])))

    # Fused table: for each n-gram n and tap k, column band holds emb @ W_n[:,:,k].T
    # (each band lane-padded to Cp); final band is emb @ wa (padded to Op).
    blocks = []
    for n in N_GRAMS:
        w = params[f"conv{n}_w"].astype(jnp.float32)        # (C_out, C_in, n)
        for k in range(n):
            blocks.append(pad_cols(emb @ w[:, :, k].T, Cp)) # (V, Cp)
    blocks.append(pad_cols(emb @ wa, Op))                   # (V, Op)
    table = jnp.concatenate(blocks, axis=1).astype(jnp.bfloat16)   # (V, 10Cp+Op)

    bias = jnp.concatenate(
        [pad_cols(params[f"conv{n}_b"].astype(jnp.float32).reshape(1, C), Cp)
         for n in N_GRAMS], axis=1)                         # (1, 4*Cp)

    wp_pad = jnp.zeros((Cp, Op), jnp.float32).at[:C, :O].set(wp)
    wl_pad = pad_cols(wl, Op)                               # (1, Op)
    lin_b = params["lin_b"].astype(jnp.float32).reshape(1, O)
    # Linear bias with -1e30 on padded class columns: masks them out of softmax.
    blin_mask = jnp.concatenate(
        [lin_b, jnp.full((1, Op - O), _NEG_BIG, jnp.float32)], axis=1)

    return {
        "table": table,          # (V, 10Cp+Op) bf16
        "bias": bias,            # (1, 4Cp)     f32
        "wp": wp_pad,            # (Cp, Op)     f32
        "wl": wl_pad,            # (1, Op)      f32
        "blin_mask": blin_mask,  # (1, Op)      f32
        "lin_b": lin_b,          # (1, O) unpadded; carries true class count via shape
    }


@jax.jit
def cnn_cbow_forward(tokens, lengths, prepped):
    """tokens: (S, B) int32 (torchtext sequence-first); lengths: (B,)."""
    S, B = tokens.shape
    O = prepped["lin_b"].shape[1]          # true class count (static from shape)
    Cp, Op = prepped["wp"].shape

    tok2d = tokens.T.reshape(B * S, 1).astype(jnp.int32)    # batch-major rows
    len2d = lengths.reshape(B, 1).astype(jnp.float32)

    # Batch tiling: single program for small batches; for big batches split the
    # batch across grid steps (sublane dim must stay a multiple of 8) so v7x's
    # two TensorCores both get work via "parallel" semantics.
    if B > 8 and B % 8 == 0:
        half = B // 2
        TB = half if half % 8 == 0 else 8
    else:
        TB = B
    grid = (pl.cdiv(B, TB),)

    def full_spec(arr):
        return pl.BlockSpec(arr.shape, lambda i: (0, 0))

    out = pl.pallas_call(
        cnn_cbow_kernel,
        out_shape=jax.ShapeDtypeStruct((B, Op), jnp.float32),
        grid=grid,
        in_specs=[
            pl.BlockSpec((TB * S, 1), lambda i: (i, 0)),    # tokens
            pl.BlockSpec((TB, 1), lambda i: (i, 0)),        # lengths
            full_spec(prepped["table"]),
            full_spec(prepped["bias"]),
            full_spec(prepped["wp"]),
            full_spec(prepped["wl"]),
            full_spec(prepped["blin_mask"]),
        ],
        out_specs=pl.BlockSpec((TB, Op), lambda i: (i, 0)),
        compiler_params=pltpu.CompilerParams(
            dimension_semantics=("parallel",)),
    )(tok2d, len2d, prepped["table"], prepped["bias"], prepped["wp"],
      prepped["wl"], prepped["blin_mask"])
    return out[:, :O]                       # drop class-lane padding outside


# --------------------------- pure-JAX reference ------------------------------


def reference_forward(tokens, lengths, params):
    S, B = tokens.shape
    emb = params["emb"][tokens]                       # (S, B, C)
    avg = emb.mean(axis=0)                            # (B, C)
    x = jnp.transpose(emb, (1, 2, 0))                 # (B, C, S)  torch layout
    feats = []
    for n in N_GRAMS:
        if S < n:
            continue
        W = params[f"conv{n}_w"]                      # (C_out, C_in, n)
        bia = params[f"conv{n}_b"]
        lout = S - n + 1
        cols = [jnp.einsum("oik,bik->bo", W,
                           lax.dynamic_slice_in_dim(x, t, n, axis=2))
                for t in range(lout)]
        feats.append(jnp.stack(cols, axis=2) + bia[None, :, None])
    cat = jnp.concatenate(feats, axis=2)
    pooled = jnp.maximum(cat, 0.0).max(axis=2)        # (B, C)
    cbow = jnp.concatenate([avg, lengths.reshape(-1, 1)], axis=1)
    ens = jnp.concatenate([pooled, cbow], axis=1)     # (B, 2C+1)
    out = ens @ params["lin_w"].T + params["lin_b"]
    return jax.nn.log_softmax(out, axis=1)


# --------------------------------- main ---------------------------------------


if __name__ == "__main__":
    VOCAB, C, S, B, OUT = 50, 32, 8, 2, 2      # small, consistent with module

    key = jax.random.PRNGKey(0)
    ks = jax.random.split(key, 12)

    params = {
        "emb": jax.random.normal(ks[0], (VOCAB, C), jnp.float32) * 0.1,
        "lin_w": jax.random.normal(ks[1], (OUT, 2 * C + 1), jnp.float32) * 0.1,
        "lin_b": jax.random.normal(ks[2], (OUT,), jnp.float32) * 0.1,
    }
    for i, n in enumerate(N_GRAMS):
        params[f"conv{n}_w"] = (
            jax.random.normal(ks[3 + 2 * i], (C, C, n), jnp.float32) * 0.05)
        params[f"conv{n}_b"] = (
            jax.random.normal(ks[4 + 2 * i], (C,), jnp.float32) * 0.05)

    tokens = jax.random.randint(ks[11], (S, B), 0, VOCAB, dtype=jnp.int32)
    lengths = jnp.array([8.0, 6.0], dtype=jnp.float32)

    prepped = prepare_params(params)            # one-time weight fusing/repacking
    out = cnn_cbow_forward(tokens, lengths, prepped)
    out = jax.block_until_ready(out)

    ref = jax.block_until_ready(reference_forward(tokens, lengths, params))
    np.testing.assert_allclose(np.asarray(out), np.asarray(ref),
                               rtol=1e-3, atol=2e-2)

    print("KERNEL_OK")
</pallas_src>

<mosaic_0001>
module attributes {stable_mosaic.version = 11 : i64} {
  func.func @cnn_cbow_kernel(%arg0: i32, %arg1: memref<16x1xi32, #tpu.memory_space<vmem>>, %arg2: memref<2x1xf32, #tpu.memory_space<vmem>>, %arg3: memref<50x1408xbf16, #tpu.memory_space<vmem>>, %arg4: memref<1x512xf32, #tpu.memory_space<vmem>>, %arg5: memref<128x128xf32, #tpu.memory_space<vmem>>, %arg6: memref<1x128xf32, #tpu.memory_space<vmem>>, %arg7: memref<1x128xf32, #tpu.memory_space<vmem>>, %arg8: memref<2x128xf32, #tpu.memory_space<vmem>>) attributes {dimension_semantics = [#tpu.dimension_semantics<parallel>], iteration_bounds = array<i64: 1>, scalar_prefetch = 0 : i64, scratch_operands = 0 : i64, tpu.core_type = #tpu.core_type<tc>, window_params = [{transform_indices = @transform_0, window_bounds = array<i64: 16, 1>}, {transform_indices = @transform_1, window_bounds = array<i64: 2, 1>}, {pipeline_mode = #tpu.pipeline_mode<synchronous>, transform_indices = @transform_2, window_bounds = array<i64: 50, 1408>}, {pipeline_mode = #tpu.pipeline_mode<synchronous>, transform_indices = @transform_3, window_bounds = array<i64: 1, 512>}, {pipeline_mode = #tpu.pipeline_mode<synchronous>, transform_indices = @transform_4, window_bounds = array<i64: 128, 128>}, {pipeline_mode = #tpu.pipeline_mode<synchronous>, transform_indices = @transform_5, window_bounds = array<i64: 1, 128>}, {pipeline_mode = #tpu.pipeline_mode<synchronous>, transform_indices = @transform_6, window_bounds = array<i64: 1, 128>}, {transform_indices = @transform_7, window_bounds = array<i64: 2, 128>}]} {
    %0 = tpu.iota {dimensions = array<i32: 1>} : vector<16x50xi32>
    %c0 = arith.constant 0 : index
    %c0_0 = arith.constant 0 : index
    %1 = vector.load %arg1[%c0, %c0_0] : memref<16x1xi32, #tpu.memory_space<vmem>>, vector<16x1xi32>
    %2 = vector.broadcast %1 : vector<16x1xi32> to vector<16x50xi32>
    %3 = arith.cmpi eq, %2, %0 : vector<16x50xi32>
    %4 = arith.extui %3 : vector<16x50xi1> to vector<16x50xi32>
    %5 = arith.sitofp %4 : vector<16x50xi32> to vector<16x50xf32>
    %6 = arith.truncf %5 : vector<16x50xf32> to vector<16x50xbf16>
    %c0_1 = arith.constant 0 : index
    %c0_2 = arith.constant 0 : index
    %7 = vector.load %arg3[%c0_1, %c0_2] : memref<50x1408xbf16, #tpu.memory_space<vmem>>, vector<50x1408xbf16>
    %cst = arith.constant dense<0.000000e+00> : vector<16x1408xf32>
    %8 = tpu.matmul %6, %7, %cst {dimension_numbers = #tpu.dot_dimension_numbers<[1], [0], [0], [1], [0, 0, 1, 1], [], []>} : vector<16x50xbf16>, vector<50x1408xbf16>, vector<16x1408xf32> -> vector<16x1408xf32>
    %9 = vector.shape_cast %8 : vector<16x1408xf32> to vector<2x8x1408xf32>
    %10 = vector.extract_strided_slice %9 {offsets = [0, 0, 0], sizes = [2, 8, 128], strides = [1, 1, 1]} : vector<2x8x1408xf32> to vector<2x8x128xf32>
    %c0_3 = arith.constant 0 : index
    %c0_4 = arith.constant 0 : index
    %11 = vector.load %arg4[%c0_3, %c0_4] : memref<1x512xf32, #tpu.memory_space<vmem>>, vector<1x128xf32>
    %12 = vector.shape_cast %11 : vector<1x128xf32> to vector<1x1x128xf32>
    %13 = vector.broadcast %12 : vector<1x1x128xf32> to vector<2x8x128xf32>
    %14 = arith.addf %10, %13 : vector<2x8x128xf32>
    %cst_5 = arith.constant 0.000000e+00 : f32
    %15 = vector.broadcast %cst_5 : f32 to vector<2x8x128xf32>
    %16 = arith.maximumf %14, %15 : vector<2x8x128xf32>
    %cst_6 = arith.constant dense<0xFF800000> : vector<2x128xf32>
    %17 = vector.multi_reduction <maximumf>, %16, %cst_6 [1] : vector<2x8x128xf32> to vector<2x128xf32>
    %18 = vector.extract_strided_slice %9 {offsets = [0, 0, 128], sizes = [2, 7, 128], strides = [1, 1, 1]} : vector<2x8x1408xf32> to vector<2x7x128xf32>
    %19 = vector.extract_strided_slice %9 {offsets = [0, 1, 256], sizes = [2, 7, 128], strides = [1, 1, 1]} : vector<2x8x1408xf32> to vector<2x7x128xf32>
    %20 = arith.addf %18, %19 : vector<2x7x128xf32>
    %c0_7 = arith.constant 0 : index
    %c128 = arith.constant 128 : index
    %21 = vector.load %arg4[%c0_7, %c128] : memref<1x512xf32, #tpu.memory_space<vmem>>, vector<1x128xf32>
    %22 = vector.shape_cast %21 : vector<1x128xf32> to vector<1x1x128xf32>
    %23 = vector.broadcast %22 : vector<1x1x128xf32> to vector<2x7x128xf32>
    %24 = arith.addf %20, %23 : vector<2x7x128xf32>
    %cst_8 = arith.constant 0.000000e+00 : f32
    %25 = vector.broadcast %cst_8 : f32 to vector<2x7x128xf32>
    %26 = arith.maximumf %24, %25 : vector<2x7x128xf32>
    %cst_9 = arith.constant dense<0xFF800000> : vector<2x128xf32>
    %27 = vector.multi_reduction <maximumf>, %26, %cst_9 [1] : vector<2x7x128xf32> to vector<2x128xf32>
    %28 = vector.extract_strided_slice %9 {offsets = [0, 0, 384], sizes = [2, 6, 128], strides = [1, 1, 1]} : vector<2x8x1408xf32> to vector<2x6x128xf32>
    %29 = vector.extract_strided_slice %9 {offsets = [0, 1, 512], sizes = [2, 6, 128], strides = [1, 1, 1]} : vector<2x8x1408xf32> to vector<2x6x128xf32>
    %30 = arith.addf %28, %29 : vector<2x6x128xf32>
    %31 = vector.extract_strided_slice %9 {offsets = [0, 2, 640], sizes = [2, 6, 128], strides = [1, 1, 1]} : vector<2x8x1408xf32> to vector<2x6x128xf32>
    %32 = arith.addf %30, %31 : vector<2x6x128xf32>
    %c0_10 = arith.constant 0 : index
    %c256 = arith.constant 256 : index
    %33 = vector.load %arg4[%c0_10, %c256] : memref<1x512xf32, #tpu.memory_space<vmem>>, vector<1x128xf32>
    %34 = vector.shape_cast %33 : vector<1x128xf32> to vector<1x1x128xf32>
    %35 = vector.broadcast %34 : vector<1x1x128xf32> to vector<2x6x128xf32>
    %36 = arith.addf %32, %35 : vector<2x6x128xf32>
    %cst_11 = arith.constant 0.000000e+00 : f32
    %37 = vector.broadcast %cst_11 : f32 to vector<2x6x128xf32>
    %38 = arith.maximumf %36, %37 : vector<2x6x128xf32>
    %cst_12 = arith.constant dense<0xFF800000> : vector<2x128xf32>
    %39 = vector.multi_reduction <maximumf>, %38, %cst_12 [1] : vector<2x6x128xf32> to vector<2x128xf32>
    %40 = vector.extract_strided_slice %9 {offsets = [0, 0, 768], sizes = [2, 5, 128], strides = [1, 1, 1]} : vector<2x8x1408xf32> to vector<2x5x128xf32>
    %41 = vector.extract_strided_slice %9 {offsets = [0, 1, 896], sizes = [2, 5, 128], strides = [1, 1, 1]} : vector<2x8x1408xf32> to vector<2x5x128xf32>
    %42 = arith.addf %40, %41 : vector<2x5x128xf32>
    %43 = vector.extract_strided_slice %9 {offsets = [0, 2, 1024], sizes = [2, 5, 128], strides = [1, 1, 1]} : vector<2x8x1408xf32> to vector<2x5x128xf32>
    %44 = arith.addf %42, %43 : vector<2x5x128xf32>
    %45 = vector.extract_strided_slice %9 {offsets = [0, 3, 1152], sizes = [2, 5, 128], strides = [1, 1, 1]} : vector<2x8x1408xf32> to vector<2x5x128xf32>
    %46 = arith.addf %44, %45 : vector<2x5x128xf32>
    %c0_13 = arith.constant 0 : index
    %c384 = arith.constant 384 : index
    %47 = vector.load %arg4[%c0_13, %c384] : memref<1x512xf32, #tpu.memory_space<vmem>>, vector<1x128xf32>
    %48 = vector.shape_cast %47 : vector<1x128xf32> to vector<1x1x128xf32>
    %49 = vector.broadcast %48 : vector<1x1x128xf32> to vector<2x5x128xf32>
    %50 = arith.addf %46, %49 : vector<2x5x128xf32>
    %cst_14 = arith.constant 0.000000e+00 : f32
    %51 = vector.broadcast %cst_14 : f32 to vector<2x5x128xf32>
    %52 = arith.maximumf %50, %51 : vector<2x5x128xf32>
    %cst_15 = arith.constant dense<0xFF800000> : vector<2x128xf32>
    %53 = vector.multi_reduction <maximumf>, %52, %cst_15 [1] : vector<2x5x128xf32> to vector<2x128xf32>
    %54 = arith.maximumf %17, %27 : vector<2x128xf32>
    %55 = arith.maximumf %54, %39 : vector<2x128xf32>
    %56 = arith.maximumf %55, %53 : vector<2x128xf32>
    %57 = vector.extract_strided_slice %9 {offsets = [0, 0, 1280], sizes = [2, 8, 128], strides = [1, 1, 1]} : vector<2x8x1408xf32> to vector<2x8x128xf32>
    %cst_16 = arith.constant dense<0.000000e+00> : vector<2x128xf32>
    %58 = vector.multi_reduction <add>, %57, %cst_16 [1] : vector<2x8x128xf32> to vector<2x128xf32>
    %cst_17 = arith.constant 8.000000e+00 : f32
    %59 = vector.broadcast %cst_17 : f32 to vector<2x128xf32>
    %60 = arith.divf %58, %59 : vector<2x128xf32>
    %c0_18 = arith.constant 0 : index
    %c0_19 = arith.constant 0 : index
    %61 = vector.load %arg5[%c0_18, %c0_19] : memref<128x128xf32, #tpu.memory_space<vmem>>, vector<128x128xf32>
    %cst_20 = arith.constant dense<0.000000e+00> : vector<2x128xf32>
    %62 = tpu.matmul %56, %61, %cst_20 {dimension_numbers = #tpu.dot_dimension_numbers<[1], [0], [0], [1], [0, 0, 1, 1], [], []>} : vector<2x128xf32>, vector<128x128xf32>, vector<2x128xf32> -> vector<2x128xf32>
    %63 = arith.addf %62, %60 : vector<2x128xf32>
    %c0_21 = arith.constant 0 : index
    %c0_22 = arith.constant 0 : index
    %64 = vector.load %arg2[%c0_21, %c0_22] : memref<2x1xf32, #tpu.memory_space<vmem>>, vector<2x1xf32>
    %c0_23 = arith.constant 0 : index
    %c0_24 = arith.constant 0 : index
    %65 = vector.load %arg6[%c0_23, %c0_24] : memref<1x128xf32, #tpu.memory_space<vmem>>, vector<1x128xf32>
    %66 = vector.broadcast %64 : vector<2x1xf32> to vector<2x128xf32>
    %67 = vector.broadcast %65 : vector<1x128xf32> to vector<2x128xf32>
    %68 = arith.mulf %66, %67 : vector<2x128xf32>
    %69 = arith.addf %63, %68 : vector<2x128xf32>
    %c0_25 = arith.constant 0 : index
    %c0_26 = arith.constant 0 : index
    %70 = vector.load %arg7[%c0_25, %c0_26] : memref<1x128xf32, #tpu.memory_space<vmem>>, vector<1x128xf32>
    %71 = vector.broadcast %70 : vector<1x128xf32> to vector<2x128xf32>
    %72 = arith.addf %69, %71 : vector<2x128xf32>
    %cst_27 = arith.constant dense<0xFF800000> : vector<2xf32>
    %73 = vector.multi_reduction <maximumf>, %72, %cst_27 [1] : vector<2x128xf32> to vector<2xf32>
    %74 = vector.shape_cast %73 : vector<2xf32> to vector<2x1xf32>
    %75 = vector.broadcast %74 : vector<2x1xf32> to vector<2x128xf32>
    %76 = arith.subf %72, %75 : vector<2x128xf32>
    %77 = math.exp %76 : vector<2x128xf32>
    %cst_28 = arith.constant dense<0.000000e+00> : vector<2xf32>
    %78 = vector.multi_reduction <add>, %77, %cst_28 [1] : vector<2x128xf32> to vector<2xf32>
    %79 = vector.shape_cast %78 : vector<2xf32> to vector<2x1xf32>
    %80 = math.log %79 : vector<2x1xf32>
    %81 = vector.broadcast %80 : vector<2x1xf32> to vector<2x128xf32>
    %82 = arith.subf %76, %81 : vector<2x128xf32>
    %c0_29 = arith.constant 0 : index
    %c0_30 = arith.constant 0 : index
    %83 = vector.load %arg8[%c0_29, %c0_30] : memref<2x128xf32, #tpu.memory_space<vmem>>, vector<2x128xf32>
    tpu.vector_store %arg8[%c0_29, %c0_30], %82 {strides = array<i32>} : memref<2x128xf32, #tpu.memory_space<vmem>>, vector<2x128xf32>,
    return
  }
  func.func @transform_0(%arg0: i32) -> (i32, i32) {
    %c0_i32 = arith.constant 0 : i32
    %c0_i32_0 = arith.constant 0 : i32
    return %arg0, %c0_i32 : i32, i32
  }
  func.func @transform_1(%arg0: i32) -> (i32, i32) {
    %c0_i32 = arith.constant 0 : i32
    %c0_i32_0 = arith.constant 0 : i32
    return %arg0, %c0_i32 : i32, i32
  }
  func.func @transform_2(%arg0: i32) -> (i32, i32) {
    %c0_i32 = arith.constant 0 : i32
    %c0_i32_0 = arith.constant 0 : i32
    %c0_i32_1 = arith.constant 0 : i32
    return %c0_i32, %c0_i32_0 : i32, i32
  }
  func.func @transform_3(%arg0: i32) -> (i32, i32) {
    %c0_i32 = arith.constant 0 : i32
    %c0_i32_0 = arith.constant 0 : i32
    %c0_i32_1 = arith.constant 0 : i32
    return %c0_i32, %c0_i32_0 : i32, i32
  }
  func.func @transform_4(%arg0: i32) -> (i32, i32) {
    %c0_i32 = arith.constant 0 : i32
    %c0_i32_0 = arith.constant 0 : i32
    %c0_i32_1 = arith.constant 0 : i32
    return %c0_i32, %c0_i32_0 : i32, i32
  }
  func.func @transform_5(%arg0: i32) -> (i32, i32) {
    %c0_i32 = arith.constant 0 : i32
    %c0_i32_0 = arith.constant 0 : i32
    %c0_i32_1 = arith.constant 0 : i32
    return %c0_i32, %c0_i32_0 : i32, i32
  }
  func.func @transform_6(%arg0: i32) -> (i32, i32) {
    %c0_i32 = arith.constant 0 : i32
    %c0_i32_0 = arith.constant 0 : i32
    %c0_i32_1 = arith.constant 0 : i32
    return %c0_i32, %c0_i32_0 : i32, i32
  }
  func.func @transform_7(%arg0: i32) -> (i32, i32) {
    %c0_i32 = arith.constant 0 : i32
    %c0_i32_0 = arith.constant 0 : i32
    return %arg0, %c0_i32 : i32, i32
  }
}

</mosaic_0001>

<bundles_post_ra>
// kernel: cnn_cbow_forward.1
= control target key start
LH: loop header
LB: loop body
LE: loop exit
PB: predicated region body
PF: predicated region fallthrough
CT: control target
= control target key end

     0   :  { %12 = vsyncpa [#allocation3], 0  ;;  %s1397_s0 = inlined_call_operand.vmem [shape: s32[16,1], index: 0, kind: input, shape index: {}]   ;;  %s1398_s1 = inlined_call_operand.vmem [shape: f32[2,1], index: 1, kind: input, shape index: {}]   ;;  %s1399_s2 = inlined_call_operand.hbm [shape: bf16[50,1408], index: 2, kind: input, shape index: {}]   ;;  %s1400_s3 = inlined_call_operand.vmem [shape: f32[1,512], index: 3, kind: input, shape index: {}]   ;;  %s1401_s4 = inlined_call_operand.hbm [shape: f32[128,128], index: 4, kind: input, shape index: {}]   ;;  %s1402_s5 = inlined_call_operand.vmem [shape: f32[1,128], index: 5, kind: input, shape index: {}]   ;;  %s1403_s6 = inlined_call_operand.vmem [shape: f32[1,128], index: 6, kind: input, shape index: {}]   ;;  %s1404_s7 = inlined_call_operand.hbm [shape: f32[2,128], index: 7, kind: output, shape index: {}]  }
   0x1   :  { %13 = vsyncpa [#allocation6], 0 }
   0x2   :  { %14 = vsyncpa [#allocation4], 0  ;;  %s1227_s24 = smov [#allocation2]   ;;  %s1155_s28 = scalar_lea.hbm %s1399_s2, 4928 }
   0x3   :  { %s24_s25 = sshll.u32 %s1227_s24, 4  ;;  %p1156_p0 = scmp.ne.s32.totalorder %s1399_s2, %s1155_s28  ;;  %s25_s25 = int_to_ptr.vmem [resolvable:$true] %s24_s25 }
   0x4   :  { %p1159_p1 = scmp.lt.u32.totalorder %s1155_s28, %s1399_s2 }
   0x6   :  { %p1161_p2 = pnand %p1159_p1, %p1156_p0 }
   0x8   :  { %1164 = shalt.err (!%p1161_p2)
}
   0x9   :  { %s1165_s10 = scalar_lea.vmem %s25_s25, 4928  ;;  %p1170_p4 = scmp.lt.s32.totalorder %s25_s25, %s25_s25 }
   0xa   :  { %p1166_p3 = scmp.ne.s32.totalorder %s25_s25, %s1165_s10  ;;  %p1171_p5 = scmp.lt.s32.totalorder %s1165_s10, %s1165_s10 }
   0xc   :  { %p1172_p6 = por %p1171_p5, %p1170_p4 }
   0xe   :  { %p1173_p7 = pnand %p1172_p6, %p1166_p3 }
  0x10   :  { %1176 = shalt.err (!%p1173_p7)
}
  0x11   :  { %s1228_s11 = smov 704   ;;  %s1229_s12 = smov 44  }
  0x12   :  { %30 = dma.hbm_to_vmem [thread:$0]  %s1399_s2, 4928, %s25_s25, [#allocation3], %s1228_s11, %s1228_s11, %s1229_s12  }
  0x13   :  { %s1230_s15 = smov [#allocation5]   ;;  %s1177_s19 = scalar_lea.hbm %s1401_s4, 2048 }
  0x14   :  { %s38_s16 = sshll.u32 %s1230_s15, 4  ;;  %p1178_p8 = scmp.ne.s32.totalorder %s1401_s4, %s1177_s19  ;;  %s39_s16 = int_to_ptr.vmem [resolvable:$true] %s38_s16 }
  0x15   :  { %p1181_p9 = scmp.lt.u32.totalorder %s1177_s19, %s1401_s4 }
  0x17   :  { %p1183_p10 = pnand %p1181_p9, %p1178_p8 }
  0x19   :  { %1186 = shalt.err (!%p1183_p10)
}
  0x1a   :  { %s1187_s24 = scalar_lea.vmem %s39_s16, 2048  ;;  %p1192_p12 = scmp.lt.s32.totalorder %s39_s16, %s39_s16 }
  0x1b   :  { %p1188_p11 = scmp.ne.s32.totalorder %s39_s16, %s1187_s24  ;;  %p1193_p13 = scmp.lt.s32.totalorder %s1187_s24, %s1187_s24 }
  0x1d   :  { %p1194_p0 = por %p1193_p13, %p1192_p12 }
  0x1f   :  { %p1195_p1 = pnand %p1194_p0, %p1188_p11 }
  0x21   :  { %1198 = shalt.err (!%p1195_p1)
}
  0x22   :  { %s1231_s2 = smov 128   ;;  %s1232_s25 = smov 8  }
  0x23   :  { %44 = dma.hbm_to_vmem [thread:$0]  %s1401_s4, 2048, %s39_s16, [#allocation6], %s1231_s2, %s1231_s2, %s1232_s25  }
  0x24   :  { %1221 = dma.done.wait [#allocation3], 4928  }
  0x25   :  { %1222 = vsyncadd [#allocation3], 4294962368 }
  0x26   :  { %1223 = dma.done.wait [#allocation6], 2048  }
  0x27   :  { %1224 = vsyncadd [#allocation6], 4294965248  ;;  %v1233_v0 = vmov 0   ;;  %v58_v1 = vld [vmem:[%s1397_s0] sm:$0xff]  ;;  %v59_v2 = vld [vmem:[%s1397_s0 + $0x8] sm:$0xff]  ;;  %vm315_vm0 = vcmask 1040384   ;;  %v56_v25 = vlaneseq }
  0x28   :  { %1090 = vset.pattern.permute.xlu0 %v1233_v0  ;;  %381 = vmatprep.mubr.bf16.mxu1 %v1233_v0  ;;  %v1092_v3 = vld [vmem:[#allocation2 + $0x4] ss:$44 sps:$4 sm:$0xff]   ;;  %v1094_v4 = vld [vmem:[#allocation2 + $0x14] ss:$44 sps:$4 sm:$0xff]   ;;  %v1098_v7 = vld [vmem:[#allocation2 + $0x5c] ss:$44 sps:$4 sm:$0xff]  }
  0x29   :  { %467 = vmatprep.mubr.bf16.mxu0 %v1233_v0  ;;  %1091 = vset.pattern.permute.xlu1 %v1233_v0  ;;  %v1096_v5 = vld [vmem:[#allocation2] ss:$44 sps:$4 sm:$0xff]   ;;  %v1097_v6 = vld [vmem:[#allocation2 + $0x10] ss:$44 sps:$4 sm:$0xff]   ;;  %v1102_v9 = vld [vmem:[#allocation2 + $0x58] ss:$44 sps:$4 sm:$0xff]  }
  0x2a   :  { %61 = vperm.xlu0 %1090, %v58_v1   ;;  %349 = vmatprep.subr.bf16.mxu1 %v1092_v3  ;;  %v1100_v8 = vld [vmem:[#allocation2 + $0x6c] ss:$44 sps:$4 sm:$0xff]   ;;  %v1103_v10 = vld [vmem:[#allocation2 + $0x68] ss:$44 sps:$4 sm:$0xff]   ;;  %v1106_v12 = vld [vmem:[#allocation2 + $0xc4] ss:$44 sps:$4 sm:$0xff]  }
  0x2b   :  { %435 = vmatprep.subr.bf16.mxu0 %v1094_v4  ;;  %350 = vmatpush1.bf16.msra.mxu1 %v1096_v5  ;;  %v1104_v11 = vld [vmem:[#allocation2 + $0xb4] ss:$44 sps:$4 sm:$0xff]   ;;  %v1108_v13 = vld [vmem:[#allocation2 + $0xb0] ss:$44 sps:$4 sm:$0xff]   ;;  %v109_v15 = vld [vmem:[#allocation2 + $0x108] sm:$0x11] }
  0x2c   :  { %436 = vmatpush1.bf16.msra.mxu0 %v1097_v6  ;;  %351 = vmatprep.subr.bf16.mxu1 %v1098_v7  ;;  %v1109_v14 = vld [vmem:[#allocation2 + $0xc0] ss:$44 sps:$4 sm:$0xff]   ;;  %v959_v16 = vcombine.high %v109_v15, %v109_v15  ;;  %v111_v17 = vld [vmem:[#allocation2 + $0x118] sm:$0x11]  ;;  %v958_v18 = vcombine.low %v109_v15, %v109_v15  ;;  %v1119_v24 = vld [vmem:[#allocation2 + $0x24] ss:$44 sps:$4 sm:$0xff]  }
  0x2d   :  { %437 = vmatprep.subr.bf16.mxu0 %v1100_v8  ;;  %v963_v19 = vcombine.high %v111_v17, %v111_v17  ;;  %v962_v20 = vcombine.low %v111_v17, %v111_v17  ;;  %v1116_v22 = vld [vmem:[#allocation2 + $0xc] ss:$44 sps:$4 sm:$0xff]   ;;  %v57_v26 = vand.u32 127, %v56_v25  ;;  %vm311_vm3 = vcmask 408576   ;;  %v1114_v32 = vld [vmem:[#allocation2 + $0x8] ss:$44 sps:$4 sm:$0xff]  }
  0x2e   :  { %64 = vperm.xlu0 %1090, %v59_v2   ;;  %v317_v21 = vsel %vm315_vm0, %v958_v18, 0  ;;  %v1234_v29 = vmov 0.0   ;;  %v1117_v33 = vld [vmem:[#allocation2 + $0x20] ss:$44 sps:$4 sm:$0xff]   ;;  %v1122_v35 = vld [vmem:[#allocation2 + $0x64] ss:$44 sps:$4 sm:$0xff]  }
  0x2f   :  { %352 = vmatpush1.bf16.msra.mxu1 %v1102_v9  ;;  %v329_v23 = vsel %vm315_vm0, %v962_v20, 0  ;;  %v1125_v36 = vld [vmem:[#allocation2 + $0x7c] ss:$44 sps:$4 sm:$0xff]   ;;  %v1120_v37 = vld [vmem:[#allocation2 + $0x60] ss:$44 sps:$4 sm:$0xff]   ;;  %vm1235_vm4 = vmmov 0  }
  0x30   :  { %438 = vmatpush1.bf16.msra.mxu0 %v1103_v10  ;;  %353 = vmatprep.subr.bf16.mxu1 %v1104_v11  ;;  %v1123_v38 = vld [vmem:[#allocation2 + $0x78] ss:$44 sps:$4 sm:$0xff]   ;;  %v1128_v39 = vld [vmem:[#allocation2 + $0xbc] ss:$44 sps:$4 sm:$0xff]   ;;  %v1131_v40 = vld [vmem:[#allocation2 + $0xd4] ss:$44 sps:$4 sm:$0xff]  }
  0x31   :  { %439 = vmatprep.subr.bf16.mxu0 %v1106_v12  ;;  %v110_v41 = vld [vmem:[#allocation2 + $0x110] sm:$0x11]  ;;  %v113_v42 = vld [vmem:[#allocation2 + $0x128] sm:$0x11]  ;;  %v1126_v43 = vld [vmem:[#allocation2 + $0xb8] ss:$44 sps:$4 sm:$0xff]  }
  0x32   :  { %v1129_v44 = vld [vmem:[#allocation2 + $0xd0] ss:$44 sps:$4 sm:$0xff]   ;;  %v961_v45 = vcombine.high %v110_v41, %v110_v41  ;;  %v967_v46 = vcombine.high %v113_v42, %v113_v42  ;;  %v960_v47 = vcombine.low %v110_v41, %v110_v41  ;;  %v966_v48 = vcombine.low %v113_v42, %v113_v42  ;;  %v1136_v52 = vld [vmem:[#allocation2 + $0x18] ss:$44 sps:$4 sm:$0xff]   ;;  %v1141_v53 = vld [vmem:[#allocation2 + $0x74] ss:$44 sps:$4 sm:$0xff]  }
  0x33   :  { %354 = vmatpush1.bf16.msra.mxu1 %v1108_v13  ;;  %v1138_v51 = vld [vmem:[#allocation2 + $0x1c] ss:$44 sps:$4 sm:$0xff]   ;;  %v1144_v55 = vld [vmem:[#allocation2 + $0xcc] ss:$44 sps:$4 sm:$0xff]   ;;  %v112_v56 = vld [vmem:[#allocation2 + $0x120] sm:$0x11] }
  0x34   :  { %440 = vmatpush1.bf16.msra.mxu0 %v1109_v14  ;;  %969 = vmatprep.subr.msk.bf16.mxu1 %vm315_vm0, %v959_v16  ;;  %v323_v49 = vsel %vm315_vm0, %v960_v47, 0  ;;  %v341_v50 = vsel %vm315_vm0, %v966_v48, 0  ;;  %v1139_v54 = vld [vmem:[#allocation2 + $0x70] ss:$44 sps:$4 sm:$0xff]   ;;  %v1142_v57 = vld [vmem:[#allocation2 + $0xc8] ss:$44 sps:$4 sm:$0xff]   ;;  %v965_v58 = vcombine.high %v112_v56, %v112_v56  ;;  %v964_v59 = vcombine.low %v112_v56, %v112_v56 }
  0x35   :  { %973 = vmatprep.subr.msk.bf16.mxu0 %vm315_vm0, %v963_v19  ;;  %v1147_v61 = vld [vmem:[#allocation2 + $0x28] ss:$44 sps:$4 sm:$0xff]   ;;  %v1148_v62 = vld [vmem:[#allocation2 + $0x80] ss:$44 sps:$4 sm:$0xff]   ;;  %v1149_v63 = vld [vmem:[#allocation2 + $0xd8] ss:$44 sps:$4 sm:$0xff]  }
  0x36   :  { %v335_v60 = vsel %vm315_vm0, %v964_v59, 0  ;;  %v775_v2 = vld [vmem:[#allocation5] sm:$0xff]  ;;  %v776_v3 = vld [vmem:[#allocation5 + $0x8] sm:$0xff]  ;;  %v1236_v5 = vmov 0.0|0.0   ;;  %v777_v6 = vld [vmem:[#allocation5 + $0x10] sm:$0xff]  ;;  %vm647_vm5 = vcmask 1046528  }
  0x37   :  { %356 = vmatpush1.bf16.msra.mxu1 %v317_v21  ;;  %v1056_v4 = vpack.c.bf16 %v776_v3, %v775_v2  ;;  %v778_v7 = vld [vmem:[#allocation5 + $0x18] sm:$0xff]  ;;  %v779_v9 = vld [vmem:[#allocation5 + $0x20] sm:$0xff]  ;;  %v780_v10 = vld [vmem:[#allocation5 + $0x28] sm:$0xff]  ;;  %vm689_vm6 = vcmask 1045504   ;;  %vm739_vm7 = vcmask 1044480   ;;  %vm793_vm8 = vcmask 1041409  }
  0x38   :  { %442 = vmatpush1.bf16.msra.mxu0 %v329_v23  ;;  %392 = vmatprep.subr.bf16.mxu1 %v1116_v22  ;;  %v1059_v8 = vpack.c.bf16 %v778_v7, %v777_v6  ;;  %v1062_v11 = vpack.c.bf16 %v780_v10, %v779_v9  ;;  %v781_v12 = vld [vmem:[#allocation5 + $0x30] sm:$0xff]  ;;  %v782_v13 = vld [vmem:[#allocation5 + $0x38] sm:$0xff]  ;;  %v783_v15 = vld [vmem:[#allocation5 + $0x40] sm:$0xff]  ;;  %vm893_vm9 = vcmask 1041408  }
  0x39   :  { %521 = vmatprep.subr.bf16.mxu0 %v1119_v24  ;;  %v1065_v14 = vpack.c.bf16 %v782_v13, %v781_v12  ;;  %v784_v16 = vld [vmem:[#allocation5 + $0x48] sm:$0xff]  ;;  %v785_v18 = vld [vmem:[#allocation5 + $0x50] sm:$0xff]  ;;  %v786_v19 = vld [vmem:[#allocation5 + $0x58] sm:$0xff] }
  0x3a   :  { %v1068_v17 = vpack.c.bf16 %v784_v16, %v783_v15  ;;  %v1071_v20 = vpack.c.bf16 %v786_v19, %v785_v18  ;;  %v787_v21 = vld [vmem:[#allocation5 + $0x60] sm:$0xff]  ;;  %v788_v22 = vld [vmem:[#allocation5 + $0x68] sm:$0xff]  ;;  %v789_v24 = vld [vmem:[#allocation5 + $0x70] sm:$0xff] }
  0x3b   :  { %v1074_v23 = vpack.c.bf16 %v788_v22, %v787_v21  ;;  %v790_v25 = vld [vmem:[#allocation5 + $0x78] sm:$0xff] }
  0xa9   :  { %v62_v27 = vpop.permute.xlu0 %61 }
  0xaa   :  { %vm66_vm1 = vcmp.eq.s32.totalorder %v62_v27, %v57_v26  ;;  %v870_v27 = vld [vmem:[%s1398_s1] sm:$0x3] }
  0xab   :  { %v923_v30 = vsel %vm66_vm1, 1.0, %v1234_v29  ;;  %874 = vperm.xlu1 %1091, %v870_v27  }
  0xad   :  { %v65_v28 = vpop.permute.xlu0 %64 }
  0xae   :  { %vm67_vm2 = vcmp.eq.s32.totalorder %v65_v28, %v57_v26  ;;  %v1077_v26 = vpack.c.bf16 %v790_v25, %v789_v24 }
  0xaf   :  { %v924_v31 = vsel %vm67_vm2, 1.0, %v1234_v29 }
  0xb0   :  { %v1318_v34 = vpack.c.bf16 %v924_v31, %v923_v30 }
  0xb2   :  { %970 = vmatmul.mubr.msk.bf16.vlgmr.msra.gmra.mrb[0].mxu1 %vm311_vm3, %v1318_v34  ;;  %974 = vmatmul.mubr.msk.bf16.vlgmr.msra.gmra.mrb[0].mxu0 %vm311_vm3, %v1318_v34 }
  0xb3   :  { %393 = vmatpush1.bf16.msra.mxu1 %v1114_v32  ;;  %522 = vmatpush1.bf16.msra.mxu0 %v1117_v33 }
  0xb4   :  { %394 = vmatprep.subr.bf16.mxu1 %v1122_v35  ;;  %523 = vmatprep.subr.bf16.mxu0 %v1125_v36 }
  0xb5   :  { %424 = vmatprep.mubr.bf16.mxu1 %v1233_v0  ;;  %553 = vmatprep.mubr.bf16.mxu0 %v1233_v0 }
  0xb7   :  { %395 = vmatpush1.bf16.msra.mxu1 %v1120_v37  ;;  %524 = vmatpush1.bf16.msra.mxu0 %v1123_v38 }
  0xb8   :  { %396 = vmatprep.subr.bf16.mxu1 %v1128_v39  ;;  %525 = vmatprep.subr.bf16.mxu0 %v1131_v40 }
  0xbb   :  { %397 = vmatpush1.bf16.msra.mxu1 %v1126_v43  ;;  %526 = vmatpush1.bf16.msra.mxu0 %v1129_v44 }
  0xbc   :  { %971 = vmatprep.subr.msk.bf16.mxu1 %vm315_vm0, %v961_v45  ;;  %977 = vmatprep.subr.msk.bf16.mxu0 %vm315_vm0, %v967_v46 }
  0xbf   :  { %399 = vmatpush1.bf16.msra.mxu1 %v323_v49  ;;  %528 = vmatpush1.bf16.msra.mxu0 %v341_v50 }
  0xc0   :  { %478 = vmatprep.subr.bf16.mxu1 %v1138_v51  ;;  %1055 = vmatprep.subr.bf16.mxu0 %v1236_v5 }
  0xc2   :  { %972 = vmatmul.mubr.msk.bf16.vlgmr.msra.gmra.mrb[4].mxu1 %vm311_vm3, %v1318_v34  ;;  %978 = vmatmul.mubr.msk.bf16.vlgmr.msra.gmra.mrb[4].mxu0 %vm311_vm3, %v1318_v34 }
  0xc3   :  { %479 = vmatpush1.bf16.msra.mxu1 %v1136_v52  ;;  %510 = vmatprep.mubr.bf16.mxu1 %v1233_v0  ;;  %v1150_v0 = vld [vmem:[#allocation2 + $0x130] ss:$0 sps:$4 sm:$0x11]   ;;  %v981_v52 = vld [vmem:[%s1400_s3 + $0x1] ss:$0 sm:$0xff] }
  0xc4   :  { %480 = vmatprep.subr.bf16.mxu1 %v1141_v53  ;;  %1052 = vmatprep.mubr.msk.f32.mxu0 %vm1235_vm4, %v1234_v29  ;;  %v347_v1 = vsel %vm315_vm0, %v1150_v0, 0 }
  0xc5   :  { %1057 = vmatpush3.bf16.msra.mxu0 %v1056_v4 }
  0xc6   :  { %1058 = vmatprep.subr.bf16.mxu0 %v1236_v5 }
  0xc7   :  { %481 = vmatpush1.bf16.msra.mxu1 %v1139_v54 }
  0xc8   :  { %482 = vmatprep.subr.bf16.mxu1 %v1144_v55 }
  0xc9   :  { %1060 = vmatpush3.bf16.msra.mxu0 %v1059_v8 }
  0xca   :  { %1061 = vmatprep.subr.bf16.mxu0 %v1236_v5 }
  0xcb   :  { %483 = vmatpush1.bf16.msra.mxu1 %v1142_v57 }
  0xcc   :  { %975 = vmatprep.subr.msk.bf16.mxu1 %vm315_vm0, %v965_v58  ;;  %v982_v58 = vld [vmem:[%s1400_s3 + $0x2] ss:$0 sm:$0xff] }
  0xcd   :  { %1063 = vmatpush3.bf16.msra.mxu0 %v1062_v11 }
  0xce   :  { %1064 = vmatprep.subr.bf16.mxu0 %v1236_v5 }
  0xcf   :  { %485 = vmatpush1.bf16.msra.mxu1 %v335_v60 }
  0xd0   :  { %1008 = vmatprep.subr.bf16.mxu1 %v1234_v29 }
  0xd1   :  { %1066 = vmatpush3.bf16.msra.mxu0 %v1065_v14 }
  0xd2   :  { %976 = vmatmul.mubr.msk.bf16.vlgmr.msra.gmra.mrb[8].mxu1 %vm311_vm3, %v1318_v34  ;;  %1067 = vmatprep.subr.bf16.mxu0 %v1236_v5 }
  0xd3   :  { %1009 = vmatpush3.bf16.msra.mxu1 %v1147_v61  ;;  %1016 = vmatprep.mubr.msk.bf16.mxu1 %vm1235_vm4, %v1234_v29 }
  0xd4   :  { %1010 = vmatprep.subr.bf16.mxu1 %v1234_v29 }
  0xd5   :  { %1069 = vmatpush3.bf16.msra.mxu0 %v1068_v17 }
  0xd6   :  { %1070 = vmatprep.subr.bf16.mxu0 %v1236_v5 }
  0xd7   :  { %1011 = vmatpush3.bf16.msra.mxu1 %v1148_v62 }
  0xd8   :  { %1012 = vmatprep.subr.bf16.mxu1 %v1234_v29 }
  0xd9   :  { %1072 = vmatpush3.bf16.msra.mxu0 %v1071_v20 }
  0xda   :  { %1073 = vmatprep.subr.bf16.mxu0 %v1236_v5 }
  0xdb   :  { %1013 = vmatpush3.bf16.msra.mxu1 %v1149_v63 }
  0xdc   :  { %1014 = vmatprep.subr.bf16.mxu1 %v1234_v29 }
  0xdd   :  { %1075 = vmatpush3.bf16.msra.mxu0 %v1074_v23 }
  0xde   :  { %1076 = vmatprep.subr.bf16.mxu0 %v1236_v5 }
  0xdf   :  { %1015 = vmatpush3.bf16.msra.mxu1 %v347_v1 }
  0xe1   :  { %1078 = vmatpush3.bf16.msra.mxu0 %v1077_v26 }
  0xe2   :  { %1017 = vmatmul.mubr.msk.bf16.vlgmr.msra.gmra.mrb[12].mxu1 %vm311_vm3, %v1318_v34  ;;  %v980_v34 = vld [vmem:[%s1400_s3] ss:$0 sm:$0xff] }
 0x185   :  { %v383_v28 = vpop.f32.mrb[0].mxu1  ;;  %v469_v29 = vpop.f32.mrb[0].mxu0 }
 0x186   :  { %v385_v30 = vpop.f32.mrb[1].mxu1  ;;  %v471_v31 = vpop.f32.mrb[1].mxu0  ;;  %v612_v37 = vadd.f32 %v980_v34, %v383_v28  ;;  %v664_v43 = vrot.slane %v469_v29, 1 }
 0x187   :  { %v387_v32 = vpop.f32.mrb[2].mxu1  ;;  %v473_v33 = vpop.f32.mrb[2].mxu0  ;;  %v672_v50 = vrot.slane %v471_v31, 2 }
 0x188   :  { %v389_v35 = vpop.f32.mrb[3].mxu1  ;;  %v475_v36 = vpop.f32.mrb[3].mxu0  ;;  %v613_v38 = vadd.f32 %v980_v34, %v387_v32  ;;  %v614_v39 = vmax.f32 %v612_v37, 0.0  ;;  %v665_v51 = vrot.slane %v473_v33, 1 }
 0x189   :  { %v673_v62 = vrot.slane %v475_v36, 2 }
 0x18a   :  { %v615_v40 = vmax.f32 %v613_v38, 0.0  ;;  %v616_v41 = vrot.slane %v614_v39, 4 }
 0x18c   :  { %v622_v42 = vrot.slane %v615_v40, 4  ;;  %v617_v49 = vmax.f32 %v614_v39, %v616_v41 }
 0x18e   :  { %v623_v56 = vmax.f32 %v615_v40, %v622_v42  ;;  %v618_v3 = vrot.slane %v617_v49, 2 }
 0x190   :  { %v624_v6 = vrot.slane %v623_v56, 2  ;;  %v619_v13 = vmax.f32 %v617_v49, %v618_v3 }
 0x192   :  { %v625_v17 = vmax.f32 %v623_v56, %v624_v6  ;;  %v620_v25 = vrot.slane %v619_v13, 1 }
 0x194   :  { %v626_v28 = vrot.slane %v625_v17, 1  ;;  %v621_v37 = vmax.f32 %v619_v13, %v620_v25 }
 0x195   :  { %v426_v44 = vpop.f32.mrb[4].mxu1  ;;  %v1356_v45 = vpop.f32.mrb[4].mxu0 }
 0x196   :  { %v630_v46 = vrot.slane %v426_v44, 1  ;;  %v428_v47 = vpop.f32.mrb[5].mxu1  ;;  %v1358_v48 = vpop.f32.mrb[5].mxu0  ;;  %v627_v42 = vmax.f32 %v625_v17, %v626_v28 }
 0x197   :  { %v668_v53 = vadd.f32 %v664_v43, %v428_v47  ;;  %v430_v54 = vpop.f32.mrb[6].mxu1  ;;  %v1363_v55 = vpop.f32.mrb[6].mxu0  ;;  %v714_v43 = vrot.slane %v1356_v45, 2  ;;  %v983_v45 = vld [vmem:[%s1400_s3 + $0x3] ss:$0 sm:$0xff] }
 0x198   :  { %v634_v57 = vadd.f32 %v630_v46, %v385_v30  ;;  %v631_v59 = vrot.slane %v430_v54, 1  ;;  %v432_v60 = vpop.f32.mrb[7].mxu1  ;;  %v1368_v61 = vpop.f32.mrb[7].mxu0  ;;  %v715_v54 = vrot.slane %v1363_v55, 2 }
 0x199   :  { %v676_v63 = vadd.f32 %v672_v50, %v668_v53  ;;  %v669_v0 = vadd.f32 %v665_v51, %v432_v60  ;;  %v722_v53 = vrot.slane %v1358_v48, 3 }
 0x19a   :  { %v643_v1 = vadd.f32 %v981_v52, %v634_v57  ;;  %v635_v2 = vadd.f32 %v631_v59, %v389_v35 }
 0x19b   :  { %v685_v4 = vadd.f32 %v982_v58, %v676_v63  ;;  %v677_v5 = vadd.f32 %v673_v62, %v669_v0  ;;  %v723_v63 = vrot.slane %v1368_v61, 3 }
 0x19c   :  { %v645_v7 = vmax.f32 %v643_v1, 0.0  ;;  %v644_v8 = vadd.f32 %v981_v52, %v635_v2 }
 0x19d   :  { %v687_v9 = vmax.f32 %v685_v4, 0.0  ;;  %v686_v10 = vadd.f32 %v982_v58, %v677_v5 }
 0x19e   :  { %v648_v11 = vsel %vm647_vm5, %v645_v7, -inf  ;;  %v646_v12 = vmax.f32 %v644_v8, 0.0 }
 0x19f   :  { %v649_v14 = vrot.slane %v648_v11, 4  ;;  %v690_v15 = vsel %vm689_vm6, %v687_v9, -inf  ;;  %v688_v16 = vmax.f32 %v686_v10, 0.0 }
 0x1a0   :  { %v691_v18 = vrot.slane %v690_v15, 4  ;;  %v655_v19 = vsel %vm647_vm5, %v646_v12, -inf }
 0x1a1   :  { %v650_v20 = vmax.f32 %v648_v11, %v649_v14  ;;  %v656_v21 = vrot.slane %v655_v19, 4  ;;  %v697_v22 = vsel %vm689_vm6, %v688_v16, -inf }
 0x1a2   :  { %v692_v23 = vmax.f32 %v690_v15, %v691_v18  ;;  %v698_v24 = vrot.slane %v697_v22, 4 }
 0x1a3   :  { %v651_v26 = vrot.slane %v650_v20, 2  ;;  %v657_v27 = vmax.f32 %v655_v19, %v656_v21 }
 0x1a4   :  { %v693_v29 = vrot.slane %v692_v23, 2  ;;  %v699_v30 = vmax.f32 %v697_v22, %v698_v24 }
 0x1a5   :  { %v652_v31 = vmax.f32 %v650_v20, %v651_v26  ;;  %v658_v32 = vrot.slane %v657_v27, 2  ;;  %v512_v33 = vpop.f32.mrb[8].mxu1 }
 0x1a6   :  { %v694_v34 = vmax.f32 %v692_v23, %v693_v29  ;;  %v700_v35 = vrot.slane %v699_v30, 2  ;;  %v514_v36 = vpop.f32.mrb[9].mxu1 }
 0x1a7   :  { %v653_v38 = vrot.slane %v652_v31, 1  ;;  %v659_v39 = vmax.f32 %v657_v27, %v658_v32  ;;  %v706_v40 = vrot.slane %v514_v36, 1  ;;  %v516_v41 = vpop.f32.mrb[10].mxu1 }
 0x1a8   :  { %v695_v44 = vrot.slane %v694_v34, 1  ;;  %v701_v46 = vmax.f32 %v699_v30, %v700_v35  ;;  %v518_v47 = vpop.f32.mrb[11].mxu1 }
 0x1a9   :  { %v654_v49 = vmax.f32 %v652_v31, %v653_v38  ;;  %v660_v50 = vrot.slane %v659_v39, 1  ;;  %v710_v51 = vadd.f32 %v706_v40, %v512_v33  ;;  %v707_v52 = vrot.slane %v518_v47, 1 }
 0x1aa   :  { %v702_v56 = vrot.slane %v701_v46, 1  ;;  %v696_v57 = vmax.f32 %v694_v34, %v695_v44  ;;  %v984_v44 = vld [vmem:[%s1402_s5] ss:$0 sm:$0xff]  ;;  %s1237_s5 = smov [#allocation7]  }
 0x1ab   :  { %v661_v58 = vmax.f32 %v659_v39, %v660_v50  ;;  %v718_v59 = vadd.f32 %v714_v43, %v710_v51  ;;  %v711_v60 = vadd.f32 %v707_v52, %v516_v41  ;;  %v754_v62 = vmax.f32 %v621_v37, %v654_v49  ;;  %v985_v52 = vld [vmem:[%s1403_s6] ss:$0 sm:$0xff]  ;;  %s913_s19 = sshll.u32 %s1237_s5, 4  ;;  %s914_s19 = int_to_ptr.vmem [resolvable:$true] %s913_s19 }
 0x1ac   :  { %v703_v0 = vmax.f32 %v701_v46, %v702_v56  ;;  %v875_v46 = vpop.permute.xlu1 %874  ;;  %s1199_s6 = scalar_lea.vmem %s914_s19, 32  ;;  %p1204_p3 = scmp.lt.s32.totalorder %s914_s19, %s914_s19 }
 0x1ad   :  { %v726_v1 = vadd.f32 %v722_v53, %v718_v59  ;;  %v719_v2 = vadd.f32 %v715_v54, %v711_v60  ;;  %v755_v3 = vmax.f32 %v627_v42, %v661_v58  ;;  %v756_v4 = vmax.f32 %v754_v62, %v696_v57  ;;  %p1200_p2 = scmp.ne.s32.totalorder %s914_s19, %s1199_s6  ;;  %p1205_p4 = scmp.lt.s32.totalorder %s1199_s6, %s1199_s6 }
 0x1ae   :  { %v883_v47 = vmul.f32 %v984_v44, %v875_v46 }
 0x1af   :  { %v735_v48 = vadd.f32 %v983_v45, %v726_v1  ;;  %v727_v5 = vadd.f32 %v723_v63, %v719_v2  ;;  %v757_v55 = vmax.f32 %v755_v3, %v703_v0  ;;  %p1206_p5 = por %p1205_p4, %p1204_p3 }
 0x1b1   :  { %v737_v6 = vmax.f32 %v735_v48, 0.0  ;;  %v736_v7 = vadd.f32 %v983_v45, %v727_v5  ;;  %p1207_p6 = pnand %p1206_p5, %p1200_p2 }
 0x1b3   :  { %v740_v8 = vsel %vm739_vm7, %v737_v6, -inf  ;;  %v738_v9 = vmax.f32 %v736_v7, 0.0 }
 0x1b4   :  { %v741_v10 = vrot.slane %v740_v8, 4 }
 0x1b5   :  { %v747_v11 = vsel %vm739_vm7, %v738_v9, -inf  ;;  %v598_v61 = vpop.f32.mrb[12].mxu1 }
 0x1b6   :  { %v742_v12 = vmax.f32 %v740_v8, %v741_v10  ;;  %v748_v13 = vrot.slane %v747_v11, 4  ;;  %v760_v14 = vrot.slane %v598_v61, 4  ;;  %v1018_v15 = vpop.f32.mrb[13].mxu1 }
 0x1b7   :  { %v601_v16 = vpop.f32.mrb[14].mxu1 }
 0x1b8   :  { %v749_v17 = vmax.f32 %v747_v11, %v748_v13  ;;  %v761_v18 = vadd.f32 %v760_v14, %v598_v61  ;;  %v766_v19 = vrot.slane %v601_v16, 4  ;;  %v1019_v20 = vpop.f32.mrb[15].mxu1  ;;  %v743_v21 = vrot.slane %v742_v12, 2 }
 0x1ba   :  { %v762_v22 = vrot.slane %v761_v18, 2  ;;  %v767_v23 = vadd.f32 %v766_v19, %v601_v16  ;;  %v744_v24 = vmax.f32 %v742_v12, %v743_v21  ;;  %v750_v25 = vrot.slane %v749_v17, 2 }
 0x1bc   :  { %v763_v26 = vadd.f32 %v762_v22, %v761_v18  ;;  %v768_v27 = vrot.slane %v767_v23, 2  ;;  %v745_v28 = vrot.slane %v744_v24, 1  ;;  %v751_v29 = vmax.f32 %v749_v17, %v750_v25 }
 0x1be   :  { %v764_v30 = vrot.slane %v763_v26, 1  ;;  %v769_v31 = vadd.f32 %v768_v27, %v767_v23  ;;  %v746_v32 = vmax.f32 %v744_v24, %v745_v28  ;;  %v752_v33 = vrot.slane %v751_v29, 1 }
 0x1c0   :  { %v765_v34 = vadd.f32 %v764_v30, %v763_v26  ;;  %v770_v35 = vrot.slane %v769_v31, 1  ;;  %v753_v36 = vmax.f32 %v751_v29, %v752_v33  ;;  %v758_v37 = vmax.f32 %v756_v4, %v746_v32 }
 0x1c2   :  { %v771_v38 = vadd.f32 %v770_v35, %v769_v31  ;;  %v759_v39 = vmax.f32 %v757_v55, %v753_v36  ;;  %v773_v41 = vmul.f32 0.125, %v765_v34 }
 0x1c4   :  { %v794_v40 = vsel %vm793_vm8, %v759_v39, %v758_v37  ;;  %v774_v42 = vmul.f32 0.125, %v771_v38 }
 0x1c5   :  { %1053 = vmatmul.mubr.f32.vlgmr.msra.gmra.mrb[8].mxu0 %v794_v40 }
 0x1c6   :  { %v798_v43 = vsel %vm793_vm8, %v774_v42, %v773_v41 }
 0x298   :  { %v866_v49 = vpop.f32.mrb[8].mxu0 }
 0x299   :  { %v867_v50 = vadd.f32 %v866_v49, %v798_v43  ;;  %v1054_v51 = vpop.f32.mrb[9].mxu0 }
 0x29b   :  { %v884_v53 = vadd.f32 %v883_v47, %v867_v50 }
 0x29d   :  { %v892_v54 = vadd.f32 %v985_v52, %v884_v53 }
 0x29f   :  { %v894_v56 = vsel %vm893_vm9, %v892_v54, -inf }
 0x2a0   :  { %895 = vmax.xlane.f32.xlu1 %v894_v56 }
 0x32d   :  { %v896_v57 = vpop.xlane.xlu1 %895 }
 0x32e   :  { %v897_v58 = vsub.f32 %v892_v54, %v896_v57 }
 0x330   :  { %v898_v59 = vmul.f32 1.442695, %v897_v58 }
 0x332   :  { %1151 = vpow2.f32 %v898_v59 }
 0x33c   :  { %v1152_v60 = vpop.eup %1151 }
 0x33d   :  { %v900_v62 = vsel %vm893_vm9, %v1152_v60, 0.0 }
 0x33e   :  { %901 = vadd.xlane.f32.xlu0 %v900_v62 }
 0x3cb   :  { %v902_v63 = vpop.xlane.xlu0 %901 }
 0x3cc   :  { %1153 = vlog2.f32 %v902_v63 }
 0x3d6   :  { %v1154_v45 = vpop.eup %1153 }
 0x3d7   :  { %v904_v0 = vmul.f32 0.6931472, %v1154_v45 }
 0x3d9   :  { %v905_v1 = vsub.f32 %v897_v58, %v904_v0 }
 0x3db   :  { %906 = vst [vmem:[#allocation7] sm:$0x3] %v905_v1 }
 0x3dc   :  { %1210 = shalt.err (!%p1207_p6)
}
 0x3dd   :  { %s1211_s22 = scalar_lea.hbm %s1404_s7, 32 }
 0x3de   :  { %p1212_p7 = scmp.ne.s32.totalorder %s1404_s7, %s1211_s22  ;;  %p1215_p8 = scmp.lt.u32.totalorder %s1211_s22, %s1404_s7 }
 0x3e0   :  { %p1217_p9 = pnand %p1215_p8, %p1212_p7 }
 0x3e2   :  { %1220 = shalt.err (!%p1217_p9)
}
 0x3e3   :  { %916 = dma.vmem_to_hbm [thread:$0]  %s914_s19, 32, %s1404_s7, [#allocation4]  }
 0x3e4   :  { %1225 = dma.done.wait [#allocation4], 32  }
 0x3e5   :  { %1226 = vsyncadd [#allocation4], 4294967264 }
 0x3e6   :  { %920 = vsyncpa [#allocation3], 1 }
 0x3e7   :  { %921 = vsyncpa [#allocation6], 1 }
 0x3e8   :  { %922 = vsyncpa [#allocation4], 1 }

</bundles_post_ra>
